<compile_context>
chip_gen: v7x
topology: tpu7x:2x2x1
jax: 0.10.0
libtpu: 0.0.40
codegen_flags: <defaults>
</compile_context>

<pallas_src>
import jax
import jax.numpy as jnp
from jax.experimental import pallas as pl
from jax.experimental.pallas import tpu as pltpu

HIDDEN = 256


def actor_kernel(x_ref, w1_ref, b12_ref, w2_ref, wmu_ref, epi_ref, o_ref):
    x = x_ref[...]
    if x.dtype != jnp.bfloat16:          # static (trace-time) dtype dispatch
        x = x.astype(jnp.bfloat16)
    # fc1 + ReLU  (bf16 MXU operands, f32 accumulate, f32 VPU elementwise)
    h1 = jnp.dot(x, w1_ref[...], preferred_element_type=jnp.float32)
    h1 = jnp.maximum(h1 + b12_ref[0:1, :], 0.0)
    # fc2 + ReLU
    h2 = jnp.dot(h1.astype(jnp.bfloat16), w2_ref[...],
                 preferred_element_type=jnp.float32)
    h2 = jnp.maximum(h2 + b12_ref[1:2, :], 0.0)
    # fc_mu + tanh, then action rescaling: tanh(.) * action_scale + action_bias
    mu = jnp.dot(h2.astype(jnp.bfloat16), wmu_ref[...],
                 preferred_element_type=jnp.float32)
    mu = jnp.tanh(mu + epi_ref[0:1, :])
    o_ref[...] = mu * epi_ref[1:2, :] + epi_ref[2:3, :]


def _pick_batch_tile(B, batch_tile):
    """Largest sublane-aligned tile that still leaves >=2 grid steps.

    Big tiles amortize the ~0.35 us per-grid-step overhead; >=2 steps keeps
    both TensorCores busy on v7x under dimension_semantics=("parallel",).
    """
    if B <= 8:
        return B                       # single tiny tile == full batch dim
    tb = min(batch_tile, B)
    tb = min(tb, -(-B // 2))           # cap at ceil(B/2): >= 2 grid steps
    tb = max(8, (tb // 8) * 8)         # sublane (8-row) alignment
    return tb


def actor_forward(x, params, batch_tile=1024):
    """x: (B, obs_dim) float32 or bfloat16 -> (B, act_dim) float32."""
    w1, b12, w2, wmu, epi = params
    B, obs_dim = x.shape
    act_dim = wmu.shape[1]

    tb = _pick_batch_tile(B, batch_tile)
    grid_b = pl.cdiv(B, tb)
    # Ragged last tile (tb does not divide B): Pallas masks the out-of-bounds
    # rows of the boundary block on both the read and the write, so no
    # wrapper jnp.pad / output slice (and no extra HBM pass over x) is needed.

    if grid_b >= 3:
        # Deeper input pipelining on the only per-step streamed operand.
        x_spec = pl.BlockSpec((tb, obs_dim), lambda i: (i, 0),
                              pipeline_mode=pl.Buffered(3))
    else:
        x_spec = pl.BlockSpec((tb, obs_dim), lambda i: (i, 0))

    # Whole-array blocks with a constant index map: weights / packed biases
    # stay resident in VMEM across all batch-grid steps (no re-DMA).
    resident = lambda arr: pl.BlockSpec(arr.shape, lambda i: (0, 0))

    xbytes = jnp.dtype(x.dtype).itemsize
    vmem_limit = min(
        32 << 20,
        3 * tb * obs_dim * xbytes      # up-to-3-deep buffered x tiles
        + 2 * tb * act_dim * 4         # double-buffered output tiles
        + (1 << 20)                    # resident bf16 weights + packed biases
        + 4 * tb * HIDDEN * 4          # f32 h1/h2 intermediates (vreg spill)
        + (12 << 20),                  # pipeline / compiler scratch slack
    )

    return pl.pallas_call(
        actor_kernel,
        out_shape=jax.ShapeDtypeStruct((B, act_dim), jnp.float32),
        grid=(grid_b,),
        in_specs=[
            x_spec,
            resident(w1), resident(b12), resident(w2),
            resident(wmu), resident(epi),
        ],
        out_specs=pl.BlockSpec((tb, act_dim), lambda i: (i, 0)),
        compiler_params=pltpu.CompilerParams(
            dimension_semantics=("parallel",),   # batch tiles are independent
            vmem_limit_bytes=int(vmem_limit),
        ),
    )(x, w1, b12, w2, wmu, epi)


def init_params(key, obs_dim, act_dim, hidden=HIDDEN):
    """Deterministic synthetic parameters matching the nn.Module shapes."""
    k1, k2, k3, k4, k5, k6 = jax.random.split(key, 6)
    # Weights stored (in, out) in bf16 (MXU-native; half the DMA bytes).
    w1 = (jax.random.normal(k1, (obs_dim, hidden), jnp.float32) * 0.05
          ).astype(jnp.bfloat16)
    w2 = (jax.random.normal(k3, (hidden, hidden), jnp.float32) * 0.05
          ).astype(jnp.bfloat16)
    wmu = (jax.random.normal(k5, (hidden, act_dim), jnp.float32) * 0.05
           ).astype(jnp.bfloat16)
    # Biases / buffers kept in f32 and packed to reduce kernel operands.
    b1 = jax.random.normal(k2, (hidden,), jnp.float32) * 0.05
    b2 = jax.random.normal(k4, (hidden,), jnp.float32) * 0.05
    bmu = jax.random.normal(k6, (act_dim,), jnp.float32) * 0.05
    b12 = jnp.stack([b1, b2], axis=0)                        # (2, hidden)
    # action_space.high = 1, low = -1  ->  scale = 1, bias = 0
    action_scale = jnp.ones((act_dim,), jnp.float32)
    action_bias = jnp.zeros((act_dim,), jnp.float32)
    epi = jnp.stack([bmu, action_scale, action_bias], axis=0)  # (3, act_dim)
    return (w1, b12, w2, wmu, epi)


def actor_ref(x, params):
    w1, b12, w2, wmu, epi = params
    xf = x.astype(jnp.float32)
    h1 = jnp.maximum(xf @ w1.astype(jnp.float32) + b12[0], 0.0)
    h2 = jnp.maximum(h1 @ w2.astype(jnp.float32) + b12[1], 0.0)
    mu = jnp.tanh(h2 @ wmu.astype(jnp.float32) + epi[0])
    return mu * epi[1] + epi[2]


if __name__ == "__main__":
    key = jax.random.PRNGKey(0)
    kx1, kx2, kp = jax.random.split(key, 3)

    obs_dim = 17     # MuJoCo-style observation
    act_dim = 6      # MuJoCo-style action
    params = init_params(kp, obs_dim, act_dim)

    # Case 1: even split -> two 128-row tiles (v7x megacore path, no ragged).
    x1 = jax.random.normal(kx1, (256, obs_dim), jnp.float32)
    out1 = jax.block_until_ready(actor_forward(x1, params))
    ref1 = actor_ref(x1, params)
    assert out1.shape == (256, act_dim)
    assert jnp.allclose(out1, ref1, atol=2e-2, rtol=2e-2)

    # Case 2: ragged batch (200 rows -> three 96-row grid steps): exercises
    # the Buffered(3) input pipeline and the masked boundary tile, with no
    # wrapper padding of x or slicing of the output.
    x2 = jax.random.normal(kx2, (200, obs_dim), jnp.float32)
    out2 = jax.block_until_ready(actor_forward(x2, params))
    ref2 = actor_ref(x2, params)
    assert out2.shape == (200, act_dim)
    assert jnp.allclose(out2, ref2, atol=2e-2, rtol=2e-2)

    print("KERNEL_OK")
</pallas_src>

<mosaic_0001>
module attributes {stable_mosaic.version = 11 : i64} {
  func.func @actor_kernel(%arg0: i32, %arg1: memref<128x17xf32, #tpu.memory_space<vmem>>, %arg2: memref<17x256xbf16, #tpu.memory_space<vmem>>, %arg3: memref<2x256xf32, #tpu.memory_space<vmem>>, %arg4: memref<256x256xbf16, #tpu.memory_space<vmem>>, %arg5: memref<256x6xbf16, #tpu.memory_space<vmem>>, %arg6: memref<3x6xf32, #tpu.memory_space<vmem>>, %arg7: memref<128x6xf32, #tpu.memory_space<vmem>>) attributes {dimension_semantics = [#tpu.dimension_semantics<parallel>], iteration_bounds = array<i64: 2>, scalar_prefetch = 0 : i64, scratch_operands = 0 : i64, tpu.core_type = #tpu.core_type<tc>, window_params = [{transform_indices = @transform_0, window_bounds = array<i64: 128, 17>}, {pipeline_mode = #tpu.pipeline_mode<synchronous>, transform_indices = @transform_1, window_bounds = array<i64: 17, 256>}, {pipeline_mode = #tpu.pipeline_mode<synchronous>, transform_indices = @transform_2, window_bounds = array<i64: 2, 256>}, {pipeline_mode = #tpu.pipeline_mode<synchronous>, transform_indices = @transform_3, window_bounds = array<i64: 256, 256>}, {pipeline_mode = #tpu.pipeline_mode<synchronous>, transform_indices = @transform_4, window_bounds = array<i64: 256, 6>}, {pipeline_mode = #tpu.pipeline_mode<synchronous>, transform_indices = @transform_5, window_bounds = array<i64: 3, 6>}, {transform_indices = @transform_6, window_bounds = array<i64: 128, 6>}]} {
    %c0 = arith.constant 0 : index
    %c0_0 = arith.constant 0 : index
    %0 = vector.load %arg1[%c0, %c0_0] : memref<128x17xf32, #tpu.memory_space<vmem>>, vector<128x17xf32>
    %1 = arith.truncf %0 : vector<128x17xf32> to vector<128x17xbf16>
    %c0_1 = arith.constant 0 : index
    %c0_2 = arith.constant 0 : index
    %2 = vector.load %arg2[%c0_1, %c0_2] : memref<17x256xbf16, #tpu.memory_space<vmem>>, vector<17x256xbf16>
    %cst = arith.constant dense<0.000000e+00> : vector<128x256xf32>
    %3 = tpu.matmul %1, %2, %cst {dimension_numbers = #tpu.dot_dimension_numbers<[1], [0], [0], [1], [0, 0, 1, 1], [], []>} : vector<128x17xbf16>, vector<17x256xbf16>, vector<128x256xf32> -> vector<128x256xf32>
    %c0_3 = arith.constant 0 : index
    %c0_4 = arith.constant 0 : index
    %4 = vector.load %arg3[%c0_3, %c0_4] : memref<2x256xf32, #tpu.memory_space<vmem>>, vector<1x256xf32>
    %5 = vector.broadcast %4 : vector<1x256xf32> to vector<128x256xf32>
    %6 = arith.addf %3, %5 : vector<128x256xf32>
    %cst_5 = arith.constant 0.000000e+00 : f32
    %7 = vector.broadcast %cst_5 : f32 to vector<128x256xf32>
    %8 = arith.maximumf %6, %7 : vector<128x256xf32>
    %9 = arith.truncf %8 : vector<128x256xf32> to vector<128x256xbf16>
    %c0_6 = arith.constant 0 : index
    %c0_7 = arith.constant 0 : index
    %10 = vector.load %arg4[%c0_6, %c0_7] : memref<256x256xbf16, #tpu.memory_space<vmem>>, vector<256x256xbf16>
    %cst_8 = arith.constant dense<0.000000e+00> : vector<128x256xf32>
    %11 = tpu.matmul %9, %10, %cst_8 {dimension_numbers = #tpu.dot_dimension_numbers<[1], [0], [0], [1], [0, 0, 1, 1], [], []>} : vector<128x256xbf16>, vector<256x256xbf16>, vector<128x256xf32> -> vector<128x256xf32>
    %c1 = arith.constant 1 : index
    %c0_9 = arith.constant 0 : index
    %12 = vector.load %arg3[%c1, %c0_9] : memref<2x256xf32, #tpu.memory_space<vmem>>, vector<1x256xf32>
    %13 = vector.broadcast %12 : vector<1x256xf32> to vector<128x256xf32>
    %14 = arith.addf %11, %13 : vector<128x256xf32>
    %cst_10 = arith.constant 0.000000e+00 : f32
    %15 = vector.broadcast %cst_10 : f32 to vector<128x256xf32>
    %16 = arith.maximumf %14, %15 : vector<128x256xf32>
    %17 = arith.truncf %16 : vector<128x256xf32> to vector<128x256xbf16>
    %c0_11 = arith.constant 0 : index
    %c0_12 = arith.constant 0 : index
    %18 = vector.load %arg5[%c0_11, %c0_12] : memref<256x6xbf16, #tpu.memory_space<vmem>>, vector<256x6xbf16>
    %cst_13 = arith.constant dense<0.000000e+00> : vector<128x6xf32>
    %19 = tpu.matmul %17, %18, %cst_13 {dimension_numbers = #tpu.dot_dimension_numbers<[1], [0], [0], [1], [0, 0, 1, 1], [], []>} : vector<128x256xbf16>, vector<256x6xbf16>, vector<128x6xf32> -> vector<128x6xf32>
    %c0_14 = arith.constant 0 : index
    %c0_15 = arith.constant 0 : index
    %20 = vector.load %arg6[%c0_14, %c0_15] : memref<3x6xf32, #tpu.memory_space<vmem>>, vector<1x6xf32>
    %21 = vector.broadcast %20 : vector<1x6xf32> to vector<128x6xf32>
    %22 = arith.addf %19, %21 : vector<128x6xf32>
    %23 = math.tanh %22 : vector<128x6xf32>
    %c1_16 = arith.constant 1 : index
    %c0_17 = arith.constant 0 : index
    %24 = vector.load %arg6[%c1_16, %c0_17] : memref<3x6xf32, #tpu.memory_space<vmem>>, vector<1x6xf32>
    %25 = vector.broadcast %24 : vector<1x6xf32> to vector<128x6xf32>
    %26 = arith.mulf %23, %25 : vector<128x6xf32>
    %c2 = arith.constant 2 : index
    %c0_18 = arith.constant 0 : index
    %27 = vector.load %arg6[%c2, %c0_18] : memref<3x6xf32, #tpu.memory_space<vmem>>, vector<1x6xf32>
    %28 = vector.broadcast %27 : vector<1x6xf32> to vector<128x6xf32>
    %29 = arith.addf %26, %28 : vector<128x6xf32>
    %c0_19 = arith.constant 0 : index
    %c0_20 = arith.constant 0 : index
    %30 = vector.load %arg7[%c0_19, %c0_20] : memref<128x6xf32, #tpu.memory_space<vmem>>, vector<128x6xf32>
    tpu.vector_store %arg7[%c0_19, %c0_20], %29 {strides = array<i32>} : memref<128x6xf32, #tpu.memory_space<vmem>>, vector<128x6xf32>,
    return
  }
  func.func @transform_0(%arg0: i32) -> (i32, i32) {
    %c0_i32 = arith.constant 0 : i32
    %c0_i32_0 = arith.constant 0 : i32
    return %arg0, %c0_i32 : i32, i32
  }
  func.func @transform_1(%arg0: i32) -> (i32, i32) {
    %c0_i32 = arith.constant 0 : i32
    %c0_i32_0 = arith.constant 0 : i32
    %c0_i32_1 = arith.constant 0 : i32
    return %c0_i32, %c0_i32_0 : i32, i32
  }
  func.func @transform_2(%arg0: i32) -> (i32, i32) {
    %c0_i32 = arith.constant 0 : i32
    %c0_i32_0 = arith.constant 0 : i32
    %c0_i32_1 = arith.constant 0 : i32
    return %c0_i32, %c0_i32_0 : i32, i32
  }
  func.func @transform_3(%arg0: i32) -> (i32, i32) {
    %c0_i32 = arith.constant 0 : i32
    %c0_i32_0 = arith.constant 0 : i32
    %c0_i32_1 = arith.constant 0 : i32
    return %c0_i32, %c0_i32_0 : i32, i32
  }
  func.func @transform_4(%arg0: i32) -> (i32, i32) {
    %c0_i32 = arith.constant 0 : i32
    %c0_i32_0 = arith.constant 0 : i32
    %c0_i32_1 = arith.constant 0 : i32
    return %c0_i32, %c0_i32_0 : i32, i32
  }
  func.func @transform_5(%arg0: i32) -> (i32, i32) {
    %c0_i32 = arith.constant 0 : i32
    %c0_i32_0 = arith.constant 0 : i32
    %c0_i32_1 = arith.constant 0 : i32
    return %c0_i32, %c0_i32_0 : i32, i32
  }
  func.func @transform_6(%arg0: i32) -> (i32, i32) {
    %c0_i32 = arith.constant 0 : i32
    %c0_i32_0 = arith.constant 0 : i32
    return %arg0, %c0_i32 : i32, i32
  }
}

</mosaic_0001>

<bundles_post_ra>
// kernel: tpu_custom_call.1
= control target key start
LH: loop header
LB: loop body
LE: loop exit
PB: predicated region body
PF: predicated region fallthrough
CT: control target
= control target key end

     0   :  { %s1525_s21 = smov 0   ;;  %s1924_s0 = inlined_call_operand.vmem [shape: f32[256,17], index: 0, kind: input, shape index: {}]   ;;  %s1925_s1 = inlined_call_operand.vmem [shape: bf16[17,256], index: 1, kind: input, shape index: {}]   ;;  %s1926_s2 = inlined_call_operand.vmem [shape: f32[2,256], index: 2, kind: input, shape index: {}]   ;;  %s1927_s3 = inlined_call_operand.vmem [shape: bf16[256,256], index: 3, kind: input, shape index: {}]   ;;  %s1928_s4 = inlined_call_operand.vmem [shape: bf16[256,6], index: 4, kind: input, shape index: {}]   ;;  %s1929_s5 = inlined_call_operand.vmem [shape: f32[3,6], index: 5, kind: input, shape index: {}]   ;;  %s1930_s6 = inlined_call_operand.vmem [shape: f32[256,6], index: 6, kind: output, shape index: {}]  }
   0x1 LB: > { %s1232_s22 = sadd.s32 4294967295, %s1487_s21   ;;  %p1236_p0 = scmp.ge.s32.totalorder %s1487_s21, 1  ;;  %s1487_s21 = sphi %s1525_s21, %s16_s21  }
   0x2   : > { %p213_p1 = scmp.lt.s32.totalorder %s1487_s21, 3 }
   0x4   : > { %p214_p2 = pnand %p1236_p0, %p213_p1 }
   0x5   : > { %v1380_v0 = vld [vmem:[%s1925_s1 + $0x4] ss:$8 sps:$4 sm:$0xff] (!%p214_p2)   ;;  %vm335_vm0 = vcmask (!%p214_p2), 1040384   ;;  %v1382_v1 = vld [vmem:[%s1925_s1] ss:$8 sps:$4 sm:$0xff] (!%p214_p2)   ;;  %v1489_v3 = vmov (!%p214_p2), 0  }
   0x6   : > { %217 = sbr.rel (%p214_p2) target bundleno = 754 (0x2f2), region = 44  ;;  %v282_v2 = vld [vmem:[%s1925_s1 + $0x10] sm:$0x11] (!%p214_p2)  ;;  %v337_v4 = vsel (!%p214_p2), %vm335_vm0, 65535, %v1489_v3  ;;  %376 = vmatprep.mubr.bf16.mxu0 (!%p214_p2), %v1489_v3  ;;  %s1237_s29 = sshll.u32 (!%p214_p2), %s1232_s22, 4  ;;  %344 = vmatprep.subr.bf16.mxu0 (!%p214_p2), %v1380_v0  ;;  %vm310_vm1 = vcmask (!%p214_p2), 138240  }
   0x7   : > { %v1244_v5 = vcombine.high (!%p214_p2), %v282_v2, %v282_v2  ;;  %v1243_v6 = vcombine.low (!%p214_p2), %v282_v2, %v282_v2  ;;  %p244_p3 = scmp.lt.s32.totalorder (!%p214_p2), %s1237_s29, 31  ;;  %v1385_v7 = vld [vmem:[%s1927_s3 + $0x4] ss:$8 sps:$4 sm:$0xff] (!%p214_p2)   ;;  %345 = vmatpush1.bf16.msra.mxu0 (!%p214_p2), %v1382_v1  ;;  %v1387_v8 = vld [vmem:[%s1927_s3] ss:$8 sps:$4 sm:$0xff] (!%p214_p2)   ;;  %vm1159_vm2 = vcmask (!%p214_p2), 48128  }
   0x8   : > { %710 = vmatprep.subr.bf16.mxu1 (!%p214_p2), %v1385_v7  ;;  %v1388_v11 = vld [vmem:[%s1927_s3 + $0x14] ss:$8 sps:$4 sm:$0xff] (!%p214_p2)   ;;  %v1390_v12 = vld [vmem:[%s1927_s3 + $0x10] ss:$8 sps:$4 sm:$0xff] (!%p214_p2)   ;;  %v1391_v13 = vld [vmem:[%s1927_s3 + $0x24] ss:$8 sps:$4 sm:$0xff] (!%p214_p2)  }
   0x9   : > { %v342_v9 = vand.u32 (!%p214_p2), %v1244_v5, %v337_v4  ;;  %v339_v10 = vand.u32 (!%p214_p2), %v1243_v6, %v337_v4  ;;  %711 = vmatpush1.bf16.msra.mxu1 (!%p214_p2), %v1387_v8  ;;  %v1393_v17 = vld [vmem:[%s1927_s3 + $0x20] ss:$8 sps:$4 sm:$0xff] (!%p214_p2)   ;;  %v1394_v18 = vld [vmem:[%s1927_s3 + $0x34] ss:$8 sps:$4 sm:$0xff] (!%p214_p2)   ;;  %v1396_v21 = vld [vmem:[%s1927_s3 + $0x30] ss:$8 sps:$4 sm:$0xff] (!%p214_p2)  }
   0xa   : > { %712 = vmatprep.subr.bf16.mxu1 (!%p214_p2), %v1388_v11  ;;  %v1397_v22 = vld [vmem:[%s1927_s3 + $0x44] ss:$8 sps:$4 sm:$0xff] (!%p214_p2)   ;;  %v1399_v24 = vld [vmem:[%s1927_s3 + $0x40] ss:$8 sps:$4 sm:$0xff] (!%p214_p2)   ;;  %v1400_v25 = vld [vmem:[%s1927_s3 + $0x54] ss:$8 sps:$4 sm:$0xff] (!%p214_p2)  }
   0xb   : > { %346 = vmatprep.subr.bf16.mxu0 (!%p214_p2), %v342_v9  ;;  %v1402_v28 = vld [vmem:[%s1927_s3 + $0x50] ss:$8 sps:$4 sm:$0xff] (!%p214_p2)   ;;  %v1403_v29 = vld [vmem:[%s1927_s3 + $0x64] ss:$8 sps:$4 sm:$0xff] (!%p214_p2)   ;;  %v1405_v31 = vld [vmem:[%s1927_s3 + $0x60] ss:$8 sps:$4 sm:$0xff] (!%p214_p2)  }
   0xc   : > { %347 = vmatpush1.bf16.msra.mxu0 (!%p214_p2), %v339_v10  ;;  %v1406_v32 = vld [vmem:[%s1927_s3 + $0x74] ss:$8 sps:$4 sm:$0xff] (!%p214_p2)   ;;  %v1408_v35 = vld [vmem:[%s1927_s3 + $0x70] ss:$8 sps:$4 sm:$0xff] (!%p214_p2)   ;;  %v1409_v36 = vld [vmem:[%s1927_s3 + $0x84] ss:$8 sps:$4 sm:$0xff] (!%p214_p2)  }
   0xd   : > { %s1932_s29 = smov (!%p244_p3, %s1237_s29), 31  ;;  %713 = vmatpush1.bf16.msra.mxu1 %v1390_v12  ;;  %v1411_v38 = vld [vmem:[%s1927_s3 + $0x80] ss:$8 sps:$4 sm:$0xff]   ;;  %v1412_v39 = vld [vmem:[%s1927_s3 + $0x94] ss:$8 sps:$4 sm:$0xff]  }
   0xe   : > { %s1238_s14 = sshll.u32 %s1932_s29, 3  ;;  %714 = vmatprep.subr.bf16.mxu1 %v1391_v13  ;;  %v1414_v42 = vld [vmem:[%s1927_s3 + $0x90] ss:$8 sps:$4 sm:$0xff]   ;;  %v1415_v43 = vld [vmem:[%s1927_s3 + $0xa4] ss:$8 sps:$4 sm:$0xff]  }
   0xf   : > { %s1567_s19 = scalar_lea.vmem %s1924_s0, %s1238_s14  ;;  %v1417_v45 = vld [vmem:[%s1927_s3 + $0xa0] ss:$8 sps:$4 sm:$0xff]   ;;  %v1418_v46 = vld [vmem:[%s1927_s3 + $0xb4] ss:$8 sps:$4 sm:$0xff]   ;;  %v1420_v49 = vld [vmem:[%s1927_s3 + $0xb0] ss:$8 sps:$4 sm:$0xff]   ;;  %s1844_s13 = scalar_lea.vmem %s1930_s6, %s1238_s14 }
  0x10   : > { %v256_v14 = vld [vmem:[%s1567_s19] sm:$0xff]  ;;  %v257_v15 = vld [vmem:[%s1567_s19 + $0x8] sm:$0xff]  ;;  %v258_v19 = vld [vmem:[%s1567_s19 + $0x10] sm:$0xff] }
  0x11   : > { %v272_v16 = vpack.c.bf16 %v257_v15, %v256_v14  ;;  %v259_v20 = vld [vmem:[%s1567_s19 + $0x18] sm:$0xff]  ;;  %715 = vmatpush1.bf16.msra.mxu1 %v1393_v17  ;;  %v260_v26 = vld [vmem:[%s1567_s19 + $0x20] sm:$0xff]  ;;  %v261_v27 = vld [vmem:[%s1567_s19 + $0x28] sm:$0xff]  ;;  %v285_v15 = vlaneseq }
  0x12   : > { %716 = vmatprep.subr.bf16.mxu1 %v1394_v18  ;;  %v273_v23 = vpack.c.bf16 %v259_v20, %v258_v19  ;;  %v274_v30 = vpack.c.bf16 %v261_v27, %v260_v26  ;;  %v262_v33 = vld [vmem:[%s1567_s19 + $0x30] sm:$0xff]  ;;  %v263_v34 = vld [vmem:[%s1567_s19 + $0x38] sm:$0xff]  ;;  %v264_v40 = vld [vmem:[%s1567_s19 + $0x40] sm:$0xff] }
  0x13   : > { %1245 = vmatmul.mubr.msk.bf16.vlgmr.msra.gmra.mrb[0].mxu0 %vm310_vm1, %v272_v16  ;;  %v275_v37 = vpack.c.bf16 %v263_v34, %v262_v33  ;;  %v265_v41 = vld [vmem:[%s1567_s19 + $0x48] sm:$0xff]  ;;  %v266_v47 = vld [vmem:[%s1567_s19 + $0x50] sm:$0xff]  ;;  %v267_v48 = vld [vmem:[%s1567_s19 + $0x58] sm:$0xff]  ;;  %v1723_v16 = vshrl.u32 %v285_v15, 7 }
  0x14   : > { %386 = vmatprep.mubr.bf16.mxu0 %v1489_v3  ;;  %v276_v44 = vpack.c.bf16 %v265_v41, %v264_v40  ;;  %v1421_v50 = vld [vmem:[%s1927_s3 + $0xc4] ss:$8 sps:$4 sm:$0xff]   ;;  %v277_v51 = vpack.c.bf16 %v267_v48, %v266_v47  ;;  %v1423_v52 = vld [vmem:[%s1927_s3 + $0xc0] ss:$8 sps:$4 sm:$0xff]   ;;  %v1424_v53 = vld [vmem:[%s1927_s3 + $0xd4] ss:$8 sps:$4 sm:$0xff]  }
  0x15   : > { %717 = vmatpush1.bf16.msra.mxu1 %v1396_v21  ;;  %v268_v54 = vld [vmem:[%s1567_s19 + $0x60] sm:$0xff]  ;;  %v269_v55 = vld [vmem:[%s1567_s19 + $0x68] sm:$0xff]  ;;  %v270_v57 = vld [vmem:[%s1567_s19 + $0x70] sm:$0xff]  ;;  %v287_v17 = vsub.s32 0, %v1723_v16  ;;  %v291_v19 = vsub.s32 1, %v1723_v16 }
  0x16   : > { %718 = vmatprep.subr.bf16.mxu1 %v1397_v22  ;;  %v278_v56 = vpack.c.bf16 %v269_v55, %v268_v54  ;;  %v271_v58 = vld [vmem:[%s1567_s19 + $0x78] sm:$0xff]  ;;  %v1427_v61 = vld [vmem:[%s1927_s3 + $0xe4] ss:$8 sps:$4 sm:$0xff]   ;;  %v1429_v62 = vld [vmem:[%s1927_s3 + $0xe0] ss:$8 sps:$4 sm:$0xff]  }
  0x17   : > { %v279_v59 = vpack.c.bf16 %v271_v58, %v270_v57  ;;  %v1426_v60 = vld [vmem:[%s1927_s3 + $0xd0] ss:$8 sps:$4 sm:$0xff]   ;;  %v1430_v63 = vld [vmem:[%s1927_s3 + $0xf4] ss:$8 sps:$4 sm:$0xff]   ;;  %v1433_v1 = vld [vmem:[%s1928_s4 + $0x40] sm:$0xff]  }
  0x18   : > { %v1432_v0 = vld [vmem:[%s1927_s3 + $0xf0] ss:$8 sps:$4 sm:$0xff]   ;;  %v1434_v2 = vld [vmem:[%s1928_s4] sm:$0xff]   ;;  %1307 = vmatprep.subr.bf16.mxu0 %v1433_v1  ;;  %v1436_v4 = vld [vmem:[%s1928_s4 + $0x8] sm:$0xff]  }
  0x19   : > { %719 = vmatpush1.bf16.msra.mxu1 %v1399_v24  ;;  %1308 = vmatpush3.bf16.msra.mxu0 %v1434_v2  ;;  %v1437_v5 = vld [vmem:[%s1928_s4 + $0x50] sm:$0xff]   ;;  %v1439_v7 = vld [vmem:[%s1928_s4 + $0x58] sm:$0xff]   ;;  %v1441_v9 = vld [vmem:[%s1928_s4 + $0x60] sm:$0xff]  }
  0x1a   : > { %720 = vmatprep.subr.bf16.mxu1 %v1400_v25  ;;  %v1438_v6 = vld [vmem:[%s1928_s4 + $0x10] sm:$0xff]   ;;  %v1440_v8 = vld [vmem:[%s1928_s4 + $0x18] sm:$0xff]   ;;  %v1442_v10 = vld [vmem:[%s1928_s4 + $0x20] sm:$0xff]  }
  0x1b   : > { %1246 = vmatmul.mubr.msk.bf16.gmra.mrb[4].mxu0 %vm310_vm1, %v273_v23  ;;  %v1443_v11 = vld [vmem:[%s1928_s4 + $0x68] sm:$0xff]   ;;  %v1445_v13 = vld [vmem:[%s1928_s4 + $0x70] sm:$0xff]   ;;  %v283_v18 = vld [vmem:[%s1926_s2] ss:$2 sm:$0x3] }
  0x1c   : > { %396 = vmatprep.mubr.bf16.mxu0 %v1489_v3  ;;  %v1444_v12 = vld [vmem:[%s1928_s4 + $0x28] sm:$0xff]   ;;  %v1446_v14 = vld [vmem:[%s1928_s4 + $0x30] sm:$0xff]   ;;  %v1732_v20 = vrot.slane %v283_v18, %v287_v17  ;;  %v1736_v21 = vrot.slane %v283_v18, %v291_v19 }
  0x1d   : > { %721 = vmatpush1.bf16.msra.mxu1 %v1402_v28 }
  0x1e   : > { %722 = vmatprep.subr.bf16.mxu1 %v1403_v29 }
  0x21   : > { %723 = vmatpush1.bf16.msra.mxu1 %v1405_v31 }
  0x22   : > { %724 = vmatprep.subr.bf16.mxu1 %v1406_v32 }
  0x23   : > { %1247 = vmatmul.mubr.msk.bf16.gmra.mrb[8].mxu0 %vm310_vm1, %v274_v30 }
  0x24   : > { %406 = vmatprep.mubr.bf16.mxu0 %v1489_v3 }
  0x25   : > { %725 = vmatpush1.bf16.msra.mxu1 %v1408_v35 }
  0x26   : > { %726 = vmatprep.subr.bf16.mxu1 %v1409_v36 }
  0x29   : > { %727 = vmatpush1.bf16.msra.mxu1 %v1411_v38 }
  0x2a   : > { %728 = vmatprep.subr.bf16.mxu1 %v1412_v39 }
  0x2b   : > { %1248 = vmatmul.mubr.msk.bf16.gmra.mrb[12].mxu0 %vm310_vm1, %v275_v37 }
  0x2c   : > { %416 = vmatprep.mubr.bf16.mxu0 %v1489_v3 }
  0x2d   : > { %729 = vmatpush1.bf16.msra.mxu1 %v1414_v42 }
  0x2e   : > { %730 = vmatprep.subr.bf16.mxu1 %v1415_v43 }
  0x31   : > { %731 = vmatpush1.bf16.msra.mxu1 %v1417_v45 }
  0x32   : > { %732 = vmatprep.subr.bf16.mxu1 %v1418_v46 }
  0x33   : > { %1249 = vmatmul.mubr.msk.bf16.gmra.mrb[16].mxu0 %vm310_vm1, %v276_v44 }
  0x34   : > { %426 = vmatprep.mubr.bf16.mxu0 %v1489_v3 }
  0x35   : > { %733 = vmatpush1.bf16.msra.mxu1 %v1420_v49 }
  0x36   : > { %734 = vmatprep.subr.bf16.mxu1 %v1421_v50 }
  0x39   : > { %735 = vmatpush1.bf16.msra.mxu1 %v1423_v52 }
  0x3a   : > { %736 = vmatprep.subr.bf16.mxu1 %v1424_v53 }
  0x3b   : > { %1250 = vmatmul.mubr.msk.bf16.gmra.mrb[20].mxu0 %vm310_vm1, %v277_v51 }
  0x3c   : > { %436 = vmatprep.mubr.bf16.mxu0 %v1489_v3 }
  0x3d   : > { %737 = vmatpush1.bf16.msra.mxu1 %v1426_v60 }
  0x3e   : > { %738 = vmatprep.subr.bf16.mxu1 %v1427_v61 }
  0x41   : > { %739 = vmatpush1.bf16.msra.mxu1 %v1429_v62 }
  0x42   : > { %740 = vmatprep.subr.bf16.mxu1 %v1430_v63 }
  0x43   : > { %1251 = vmatmul.mubr.msk.bf16.gmra.mrb[24].mxu0 %vm310_vm1, %v278_v56 }
  0x44   : > { %446 = vmatprep.mubr.bf16.mxu0 %v1489_v3  ;;  %v1435_v3 = vld [vmem:[%s1928_s4 + $0x48] sm:$0xff]  }
  0x45   : > { %741 = vmatpush1.bf16.msra.mxu1 %v1432_v0  ;;  %1309 = vmatprep.subr.bf16.mxu0 %v1435_v3 }
  0x46   : > { %1310 = vmatpush3.bf16.msra.mxu0 %v1436_v4 }
  0x47   : > { %1311 = vmatprep.subr.bf16.mxu0 %v1437_v5 }
  0x4a   : > { %1312 = vmatpush3.bf16.msra.mxu0 %v1438_v6 }
  0x4b   : > { %1252 = vmatmul.mubr.msk.bf16.gmra.mrb[28].mxu0 %vm310_vm1, %v279_v59  ;;  %1313 = vmatprep.subr.bf16.mxu0 %v1439_v7 }
  0x4e   : > { %1314 = vmatpush3.bf16.msra.mxu0 %v1440_v8 }
  0x4f   : > { %1315 = vmatprep.subr.bf16.mxu0 %v1441_v9 }
  0x52   : > { %1316 = vmatpush3.bf16.msra.mxu0 %v1442_v10 }
  0x53   : > { %1317 = vmatprep.subr.bf16.mxu0 %v1443_v11 }
  0x56   : > { %1318 = vmatpush3.bf16.msra.mxu0 %v1444_v12 }
  0x57   : > { %1319 = vmatprep.subr.bf16.mxu0 %v1445_v13 }
  0x5a   : > { %1320 = vmatpush3.bf16.msra.mxu0 %v1446_v14 }
  0xe6   : > { %v378_v22 = vpop.f32.mrb[0].mxu0 }
  0xe7   : > { %v379_v23 = vadd.f32 %v378_v22, %v1732_v20  ;;  %v380_v24 = vpop.f32.mrb[1].mxu0 }
  0xe8   : > { %v381_v25 = vadd.f32 %v380_v24, %v1736_v21  ;;  %v382_v26 = vpop.f32.mrb[2].mxu0 }
  0xe9   : > { %v383_v27 = vadd.f32 %v382_v26, %v1732_v20  ;;  %v384_v28 = vpop.f32.mrb[3].mxu0  ;;  %v457_v30 = vmax.f32 %v379_v23, 0.0 }
  0xea   : > { %v385_v29 = vadd.f32 %v384_v28, %v1736_v21  ;;  %v458_v32 = vmax.f32 %v381_v25, 0.0 }
  0xeb   : > { %v459_v31 = vmax.f32 %v383_v27, 0.0 }
  0xec   : > { %v460_v33 = vmax.f32 %v385_v29, 0.0 }
  0xed   : > { %v489_v34 = vpack.c.bf16 %v459_v31, %v457_v30 }
  0xee   : > { %v388_v35 = vpop.f32.mrb[4].mxu0  ;;  %v490_v36 = vpack.c.bf16 %v460_v33, %v458_v32 }
  0xef   : > { %v389_v37 = vadd.f32 %v388_v35, %v1732_v20  ;;  %v390_v38 = vpop.f32.mrb[5].mxu0 }
  0xf0   : > { %v391_v39 = vadd.f32 %v390_v38, %v1736_v21  ;;  %v392_v40 = vpop.f32.mrb[6].mxu0  ;;  %742 = vmatprep.mubr.bf16.mxu1 %v490_v36 }
  0xf1   : > { %v393_v41 = vadd.f32 %v392_v40, %v1732_v20  ;;  %v394_v42 = vpop.f32.mrb[7].mxu0  ;;  %743 = vmatmul.mubr.bf16.vlgmr.msra.gmra.mrb[0].mxu1 %v489_v34  ;;  %v461_v44 = vmax.f32 %v389_v37, 0.0 }
  0xf2   : > { %v395_v43 = vadd.f32 %v394_v42, %v1736_v21  ;;  %v462_v46 = vmax.f32 %v391_v39, 0.0 }
  0xf3   : > { %v463_v45 = vmax.f32 %v393_v41, 0.0 }
  0xf4   : > { %v464_v47 = vmax.f32 %v395_v43, 0.0 }
  0xf5   : > { %v491_v48 = vpack.c.bf16 %v463_v45, %v461_v44 }
  0xf6   : > { %v492_v49 = vpack.c.bf16 %v464_v47, %v462_v46  ;;  %v398_v50 = vpop.f32.mrb[8].mxu0 }
  0xf7   : > { %v399_v51 = vadd.f32 %v398_v50, %v1732_v20  ;;  %v400_v52 = vpop.f32.mrb[9].mxu0 }
  0xf8   : > { %v401_v53 = vadd.f32 %v400_v52, %v1736_v21  ;;  %v402_v54 = vpop.f32.mrb[10].mxu0  ;;  %752 = vmatprep.mubr.bf16.mxu1 %v492_v49 }
  0xf9   : > { %v403_v55 = vadd.f32 %v402_v54, %v1732_v20  ;;  %v404_v56 = vpop.f32.mrb[11].mxu0  ;;  %753 = vmatmul.mubr.bf16.gmra.mrb[4].mxu1 %v491_v48  ;;  %v465_v58 = vmax.f32 %v399_v51, 0.0 }
  0xfa   : > { %v405_v57 = vadd.f32 %v404_v56, %v1736_v21  ;;  %v466_v60 = vmax.f32 %v401_v53, 0.0 }
  0xfb   : > { %v467_v59 = vmax.f32 %v403_v55, 0.0 }
  0xfc   : > { %v468_v61 = vmax.f32 %v405_v57, 0.0 }
  0xfd   : > { %v493_v62 = vpack.c.bf16 %v467_v59, %v465_v58 }
  0xfe   : > { %v494_v63 = vpack.c.bf16 %v468_v61, %v466_v60  ;;  %v408_v0 = vpop.f32.mrb[12].mxu0 }
  0xff   : > { %v409_v1 = vadd.f32 %v408_v0, %v1732_v20  ;;  %v410_v2 = vpop.f32.mrb[13].mxu0 }
 0x100   : > { %v411_v3 = vadd.f32 %v410_v2, %v1736_v21  ;;  %v412_v4 = vpop.f32.mrb[14].mxu0  ;;  %762 = vmatprep.mubr.bf16.mxu1 %v494_v63 }
 0x101   : > { %v413_v5 = vadd.f32 %v412_v4, %v1732_v20  ;;  %v414_v6 = vpop.f32.mrb[15].mxu0  ;;  %763 = vmatmul.mubr.bf16.gmra.mrb[8].mxu1 %v493_v62  ;;  %v469_v8 = vmax.f32 %v409_v1, 0.0 }
 0x102   : > { %v415_v7 = vadd.f32 %v414_v6, %v1736_v21  ;;  %v470_v10 = vmax.f32 %v411_v3, 0.0 }
 0x103   : > { %v471_v9 = vmax.f32 %v413_v5, 0.0 }
 0x104   : > { %v472_v11 = vmax.f32 %v415_v7, 0.0 }
 0x105   : > { %v495_v12 = vpack.c.bf16 %v471_v9, %v469_v8 }
 0x106   : > { %v496_v13 = vpack.c.bf16 %v472_v11, %v470_v10  ;;  %v418_v14 = vpop.f32.mrb[16].mxu0  ;;  %v1447_v11 = vld [vmem:[%s1928_s4 + $0x78] sm:$0xff]  }
 0x107   : > { %v419_v15 = vadd.f32 %v418_v14, %v1732_v20  ;;  %v420_v18 = vpop.f32.mrb[17].mxu0  ;;  %1321 = vmatprep.subr.bf16.mxu0 %v1447_v11 }
 0x108   : > { %v421_v22 = vadd.f32 %v420_v18, %v1736_v21  ;;  %v422_v23 = vpop.f32.mrb[18].mxu0  ;;  %772 = vmatprep.mubr.bf16.mxu1 %v496_v13 }
 0x109   : > { %v423_v24 = vadd.f32 %v422_v23, %v1732_v20  ;;  %v424_v25 = vpop.f32.mrb[19].mxu0  ;;  %773 = vmatmul.mubr.bf16.gmra.mrb[12].mxu1 %v495_v12  ;;  %v473_v27 = vmax.f32 %v419_v15, 0.0 }
 0x10a   : > { %v425_v26 = vadd.f32 %v424_v25, %v1736_v21  ;;  %v474_v29 = vmax.f32 %v421_v22, 0.0 }
 0x10b   : > { %v475_v28 = vmax.f32 %v423_v24, 0.0 }
 0x10c   : > { %v476_v30 = vmax.f32 %v425_v26, 0.0 }
 0x10d   : > { %v497_v31 = vpack.c.bf16 %v475_v28, %v473_v27 }
 0x10e   : > { %v498_v32 = vpack.c.bf16 %v476_v30, %v474_v29  ;;  %v428_v33 = vpop.f32.mrb[20].mxu0 }
 0x10f   : > { %v429_v34 = vadd.f32 %v428_v33, %v1732_v20  ;;  %v430_v35 = vpop.f32.mrb[21].mxu0 }
 0x110   : > { %v431_v36 = vadd.f32 %v430_v35, %v1736_v21  ;;  %v432_v37 = vpop.f32.mrb[22].mxu0  ;;  %782 = vmatprep.mubr.bf16.mxu1 %v498_v32 }
 0x111   : > { %v433_v38 = vadd.f32 %v432_v37, %v1732_v20  ;;  %v434_v39 = vpop.f32.mrb[23].mxu0  ;;  %783 = vmatmul.mubr.bf16.gmra.mrb[16].mxu1 %v497_v31  ;;  %v477_v41 = vmax.f32 %v429_v34, 0.0 }
 0x112   : > { %v435_v40 = vadd.f32 %v434_v39, %v1736_v21  ;;  %v478_v43 = vmax.f32 %v431_v36, 0.0 }
 0x113   : > { %v479_v42 = vmax.f32 %v433_v38, 0.0 }
 0x114   : > { %v480_v44 = vmax.f32 %v435_v40, 0.0 }
 0x115   : > { %v499_v45 = vpack.c.bf16 %v479_v42, %v477_v41 }
 0x116   : > { %v500_v46 = vpack.c.bf16 %v480_v44, %v478_v43  ;;  %v438_v47 = vpop.f32.mrb[24].mxu0 }
 0x117   : > { %v439_v48 = vadd.f32 %v438_v47, %v1732_v20  ;;  %v440_v49 = vpop.f32.mrb[25].mxu0 }
 0x118   : > { %v441_v50 = vadd.f32 %v440_v49, %v1736_v21  ;;  %v442_v51 = vpop.f32.mrb[26].mxu0  ;;  %792 = vmatprep.mubr.bf16.mxu1 %v500_v46 }
 0x119   : > { %v443_v52 = vadd.f32 %v442_v51, %v1732_v20  ;;  %v444_v53 = vpop.f32.mrb[27].mxu0  ;;  %793 = vmatmul.mubr.bf16.gmra.mrb[20].mxu1 %v499_v45  ;;  %v481_v55 = vmax.f32 %v439_v48, 0.0 }
 0x11a   : > { %v445_v54 = vadd.f32 %v444_v53, %v1736_v21  ;;  %v482_v57 = vmax.f32 %v441_v50, 0.0 }
 0x11b   : > { %v483_v56 = vmax.f32 %v443_v52, 0.0 }
 0x11c   : > { %v484_v58 = vmax.f32 %v445_v54, 0.0 }
 0x11d   : > { %v501_v59 = vpack.c.bf16 %v483_v56, %v481_v55 }
 0x11e   : > { %v502_v60 = vpack.c.bf16 %v484_v58, %v482_v57  ;;  %v448_v61 = vpop.f32.mrb[28].mxu0 }
 0x11f   : > { %v449_v62 = vadd.f32 %v448_v61, %v1732_v20  ;;  %v450_v63 = vpop.f32.mrb[29].mxu0 }
 0x120   : > { %v451_v0 = vadd.f32 %v450_v63, %v1736_v21  ;;  %v452_v1 = vpop.f32.mrb[30].mxu0  ;;  %802 = vmatprep.mubr.bf16.mxu1 %v502_v60 }
 0x121   : > { %v453_v2 = vadd.f32 %v452_v1, %v1732_v20  ;;  %v454_v3 = vpop.f32.mrb[31].mxu0  ;;  %803 = vmatmul.mubr.bf16.gmra.mrb[24].mxu1 %v501_v59  ;;  %v485_v5 = vmax.f32 %v449_v62, 0.0  ;;  %v1448_v20 = vld [vmem:[%s1928_s4 + $0x38] sm:$0xff]  }
 0x122   : > { %v455_v4 = vadd.f32 %v454_v3, %v1736_v21  ;;  %v486_v7 = vmax.f32 %v451_v0, 0.0  ;;  %1322 = vmatpush3.bf16.msra.mxu0 %v1448_v20  ;;  %v1253_v21 = vld [vmem:[%s1926_s2 + $0x1] ss:$2 sm:$0x3] }
 0x123   : > { %v487_v6 = vmax.f32 %v453_v2, 0.0  ;;  %v1781_v12 = vrot.slane %v1253_v21, %v287_v17  ;;  %v1785_v13 = vrot.slane %v1253_v21, %v291_v19 }
 0x124   : > { %v488_v8 = vmax.f32 %v455_v4, 0.0 }
 0x125   : > { %v503_v9 = vpack.c.bf16 %v487_v6, %v485_v5 }
 0x126   : > { %v504_v10 = vpack.c.bf16 %v488_v8, %v486_v7 }
 0x128   : > { %812 = vmatprep.mubr.bf16.mxu1 %v504_v10 }
 0x129   : > { %813 = vmatmul.mubr.bf16.gmra.mrb[28].mxu1 %v503_v9 }
 0x1c4   : > { %v744_v14 = vpop.f32.mrb[0].mxu1 }
 0x1c5   : > { %v745_v15 = vadd.f32 %v744_v14, %v1781_v12  ;;  %v746_v18 = vpop.f32.mrb[1].mxu1 }
 0x1c6   : > { %v747_v22 = vadd.f32 %v746_v18, %v1785_v13  ;;  %v748_v23 = vpop.f32.mrb[2].mxu1 }
 0x1c7   : > { %v749_v24 = vadd.f32 %v748_v23, %v1781_v12  ;;  %v750_v25 = vpop.f32.mrb[3].mxu1  ;;  %v823_v27 = vmax.f32 %v745_v15, 0.0 }
 0x1c8   : > { %v751_v26 = vadd.f32 %v750_v25, %v1785_v13  ;;  %v824_v17 = vmax.f32 %v747_v22, 0.0 }
 0x1c9   : > { %v825_v28 = vmax.f32 %v749_v24, 0.0 }
 0x1ca   : > { %v826_v29 = vmax.f32 %v751_v26, 0.0 }
 0x1cb   : > { %v855_v30 = vpack.c.bf16 %v825_v28, %v823_v27 }
 0x1cc   : > { %v856_v16 = vpack.c.bf16 %v826_v29, %v824_v17  ;;  %v754_v19 = vpop.f32.mrb[4].mxu1 }
 0x1cd   : > { %v755_v31 = vadd.f32 %v754_v19, %v1781_v12  ;;  %v756_v32 = vpop.f32.mrb[5].mxu1 }
 0x1ce   : > { %v757_v33 = vadd.f32 %v756_v32, %v1785_v13  ;;  %v758_v34 = vpop.f32.mrb[6].mxu1  ;;  %1036 = vmatprep.mubr.bf16.mxu0 %v856_v16 }
 0x1cf   : > { %v759_v35 = vadd.f32 %v758_v34, %v1781_v12  ;;  %v760_v36 = vpop.f32.mrb[7].mxu1  ;;  %1037 = vmatmul.mubr.bf16.vlgmr.msra.gmra.mrb[32].mxu0 %v855_v30  ;;  %v827_v38 = vmax.f32 %v755_v31, 0.0 }
 0x1d0   : > { %v761_v37 = vadd.f32 %v760_v36, %v1785_v13  ;;  %v828_v40 = vmax.f32 %v757_v33, 0.0 }
 0x1d1   : > { %v829_v39 = vmax.f32 %v759_v35, 0.0 }
 0x1d2   : > { %v830_v41 = vmax.f32 %v761_v37, 0.0 }
 0x1d3   : > { %v857_v42 = vpack.c.bf16 %v829_v39, %v827_v38 }
 0x1d4   : > { %v858_v43 = vpack.c.bf16 %v830_v41, %v828_v40  ;;  %v764_v44 = vpop.f32.mrb[8].mxu1 }
 0x1d5   : > { %v765_v45 = vadd.f32 %v764_v44, %v1781_v12  ;;  %v766_v46 = vpop.f32.mrb[9].mxu1 }
 0x1d6   : > { %v767_v47 = vadd.f32 %v766_v46, %v1785_v13  ;;  %v768_v48 = vpop.f32.mrb[10].mxu1  ;;  %1044 = vmatprep.mubr.bf16.mxu0 %v858_v43 }
 0x1d7   : > { %v769_v49 = vadd.f32 %v768_v48, %v1781_v12  ;;  %v770_v50 = vpop.f32.mrb[11].mxu1  ;;  %1045 = vmatmul.mubr.bf16.gmra.mrb[36].mxu0 %v857_v42  ;;  %v831_v52 = vmax.f32 %v765_v45, 0.0 }
 0x1d8   : > { %v771_v51 = vadd.f32 %v770_v50, %v1785_v13  ;;  %v832_v54 = vmax.f32 %v767_v47, 0.0 }
 0x1d9   : > { %v833_v53 = vmax.f32 %v769_v49, 0.0 }
 0x1da   : > { %v834_v55 = vmax.f32 %v771_v51, 0.0 }
 0x1db   : > { %v859_v56 = vpack.c.bf16 %v833_v53, %v831_v52 }
 0x1dc   : > { %v860_v57 = vpack.c.bf16 %v834_v55, %v832_v54  ;;  %v774_v58 = vpop.f32.mrb[12].mxu1 }
 0x1dd   : > { %v775_v59 = vadd.f32 %v774_v58, %v1781_v12  ;;  %v776_v60 = vpop.f32.mrb[13].mxu1 }
 0x1de   : > { %v777_v61 = vadd.f32 %v776_v60, %v1785_v13  ;;  %v778_v62 = vpop.f32.mrb[14].mxu1  ;;  %1052 = vmatprep.mubr.bf16.mxu0 %v860_v57 }
 0x1df   : > { %v779_v63 = vadd.f32 %v778_v62, %v1781_v12  ;;  %v780_v0 = vpop.f32.mrb[15].mxu1  ;;  %1053 = vmatmul.mubr.bf16.gmra.mrb[40].mxu0 %v859_v56  ;;  %v835_v2 = vmax.f32 %v775_v59, 0.0 }
 0x1e0   : > { %v781_v1 = vadd.f32 %v780_v0, %v1785_v13  ;;  %v836_v4 = vmax.f32 %v777_v61, 0.0 }
 0x1e1   : > { %v837_v3 = vmax.f32 %v779_v63, 0.0 }
 0x1e2   : > { %v838_v5 = vmax.f32 %v781_v1, 0.0 }
 0x1e3   : > { %v861_v6 = vpack.c.bf16 %v837_v3, %v835_v2  ;;  %v1822_v3 = vld [vmem:[%s1929_s5] ss:$0 sm:$0xff] }
 0x1e4   : > { %v862_v7 = vpack.c.bf16 %v838_v5, %v836_v4  ;;  %v784_v8 = vpop.f32.mrb[16].mxu1 }
 0x1e5   : > { %v785_v9 = vadd.f32 %v784_v8, %v1781_v12  ;;  %v786_v10 = vpop.f32.mrb[17].mxu1 }
 0x1e6   : > { %v787_v11 = vadd.f32 %v786_v10, %v1785_v13  ;;  %v788_v20 = vpop.f32.mrb[18].mxu1  ;;  %1060 = vmatprep.mubr.bf16.mxu0 %v862_v7 }
 0x1e7   : > { %v789_v21 = vadd.f32 %v788_v20, %v1781_v12  ;;  %v790_v14 = vpop.f32.mrb[19].mxu1  ;;  %1061 = vmatmul.mubr.bf16.gmra.mrb[44].mxu0 %v861_v6  ;;  %v839_v18 = vmax.f32 %v785_v9, 0.0 }
 0x1e8   : > { %v791_v15 = vadd.f32 %v790_v14, %v1785_v13  ;;  %v840_v23 = vmax.f32 %v787_v11, 0.0 }
 0x1e9   : > { %v841_v22 = vmax.f32 %v789_v21, 0.0 }
 0x1ea   : > { %v842_v24 = vmax.f32 %v791_v15, 0.0 }
 0x1eb   : > { %v863_v25 = vpack.c.bf16 %v841_v22, %v839_v18  ;;  %v1830_v18 = vld [vmem:[%s1929_s5 + $0x1] ss:$0 sm:$0xff] }
 0x1ec   : > { %v864_v26 = vpack.c.bf16 %v842_v24, %v840_v23  ;;  %v794_v27 = vpop.f32.mrb[20].mxu1  ;;  %v1836_v24 = vld [vmem:[%s1929_s5 + $0x2] ss:$0 sm:$0xff] }
 0x1ed   : > { %v795_v28 = vadd.f32 %v794_v27, %v1781_v12  ;;  %v796_v17 = vpop.f32.mrb[21].mxu1 }
 0x1ee   : > { %v797_v29 = vadd.f32 %v796_v17, %v1785_v13  ;;  %v798_v30 = vpop.f32.mrb[22].mxu1  ;;  %1068 = vmatprep.mubr.bf16.mxu0 %v864_v26 }
 0x1ef   : > { %v799_v16 = vadd.f32 %v798_v30, %v1781_v12  ;;  %v800_v19 = vpop.f32.mrb[23].mxu1  ;;  %1069 = vmatmul.mubr.bf16.gmra.mrb[48].mxu0 %v863_v25  ;;  %v843_v32 = vmax.f32 %v795_v28, 0.0 }
 0x1f0   : > { %v801_v31 = vadd.f32 %v800_v19, %v1785_v13  ;;  %v844_v34 = vmax.f32 %v797_v29, 0.0 }
 0x1f1   : > { %v845_v33 = vmax.f32 %v799_v16, 0.0 }
 0x1f2   : > { %v846_v35 = vmax.f32 %v801_v31, 0.0 }
 0x1f3   : > { %v865_v36 = vpack.c.bf16 %v845_v33, %v843_v32 }
 0x1f4   : > { %v866_v37 = vpack.c.bf16 %v846_v35, %v844_v34  ;;  %v804_v38 = vpop.f32.mrb[24].mxu1 }
 0x1f5   : > { %v805_v39 = vadd.f32 %v804_v38, %v1781_v12  ;;  %v806_v40 = vpop.f32.mrb[25].mxu1 }
 0x1f6   : > { %v807_v41 = vadd.f32 %v806_v40, %v1785_v13  ;;  %v808_v42 = vpop.f32.mrb[26].mxu1  ;;  %1076 = vmatprep.mubr.bf16.mxu0 %v866_v37 }
 0x1f7   : > { %v809_v43 = vadd.f32 %v808_v42, %v1781_v12  ;;  %v810_v44 = vpop.f32.mrb[27].mxu1  ;;  %1077 = vmatmul.mubr.bf16.gmra.mrb[52].mxu0 %v865_v36  ;;  %v847_v46 = vmax.f32 %v805_v39, 0.0 }
 0x1f8   : > { %v811_v45 = vadd.f32 %v810_v44, %v1785_v13  ;;  %v848_v48 = vmax.f32 %v807_v41, 0.0 }
 0x1f9   : > { %v849_v47 = vmax.f32 %v809_v43, 0.0 }
 0x1fa   : > { %v850_v49 = vmax.f32 %v811_v45, 0.0 }
 0x1fb   : > { %v867_v50 = vpack.c.bf16 %v849_v47, %v847_v46 }
 0x1fc   : > { %v868_v51 = vpack.c.bf16 %v850_v49, %v848_v48  ;;  %v814_v52 = vpop.f32.mrb[28].mxu1 }
 0x1fd   : > { %v815_v53 = vadd.f32 %v814_v52, %v1781_v12  ;;  %v816_v54 = vpop.f32.mrb[29].mxu1 }
 0x1fe   : > { %v817_v55 = vadd.f32 %v816_v54, %v1785_v13  ;;  %v818_v56 = vpop.f32.mrb[30].mxu1  ;;  %1084 = vmatprep.mubr.bf16.mxu0 %v868_v51 }
 0x1ff   : > { %v819_v57 = vadd.f32 %v818_v56, %v1781_v12  ;;  %v820_v58 = vpop.f32.mrb[31].mxu1  ;;  %1085 = vmatmul.mubr.bf16.gmra.mrb[56].mxu0 %v867_v50  ;;  %v851_v60 = vmax.f32 %v815_v53, 0.0 }
 0x200   : > { %v821_v59 = vadd.f32 %v820_v58, %v1785_v13  ;;  %v852_v62 = vmax.f32 %v817_v55, 0.0 }
 0x201   : > { %v853_v61 = vmax.f32 %v819_v57, 0.0 }
 0x202   : > { %v854_v63 = vmax.f32 %v821_v59, 0.0 }
 0x203   : > { %v869_v0 = vpack.c.bf16 %v853_v61, %v851_v60 }
 0x204   : > { %v870_v1 = vpack.c.bf16 %v854_v63, %v852_v62 }
 0x206   : > { %1092 = vmatprep.mubr.bf16.mxu0 %v870_v1 }
 0x207   : > { %1093 = vmatmul.mubr.bf16.gmra.mrb[60].mxu0 %v869_v0 }
 0x2a2   : > { %v1323_v2 = vpop.f32.mrb[32].mxu0 }
 0x2a3   : > { %v1324_v4 = vpop.f32.mrb[33].mxu0 }
 0x2a4   : > { %v1325_v12 = vadd.f32 %v1324_v4, %v1323_v2  ;;  %v1326_v5 = vpop.f32.mrb[34].mxu0 }
 0x2a5   : > { %v1327_v6 = vpop.f32.mrb[35].mxu0 }
 0x2a6   : > { %v1039_v13 = vadd.f32 %v1325_v12, %v1822_v3  ;;  %v1328_v7 = vadd.f32 %v1327_v6, %v1326_v5 }
 0x2a8   : > { %1449 = vtanh.f32 %v1039_v13  ;;  %v1042_v8 = vadd.f32 %v1328_v7, %v1822_v3 }
 0x2aa   : > { %1451 = vtanh.f32 %v1042_v8  ;;  %v1329_v9 = vpop.f32.mrb[36].mxu0 }
 0x2ab   : > { %v1330_v10 = vpop.f32.mrb[37].mxu0 }
 0x2ac   : > { %v1331_v11 = vadd.f32 %v1330_v10, %v1329_v9  ;;  %v1332_v20 = vpop.f32.mrb[38].mxu0 }
 0x2ad   : > { %v1333_v21 = vpop.f32.mrb[39].mxu0 }
 0x2ae   : > { %v1047_v14 = vadd.f32 %v1331_v11, %v1822_v3  ;;  %v1334_v15 = vadd.f32 %v1333_v21, %v1332_v20 }
 0x2b0   : > { %1453 = vtanh.f32 %v1047_v14  ;;  %v1050_v22 = vadd.f32 %v1334_v15, %v1822_v3 }
 0x2b2   : > { %v1450_v23 = vpop.eup %1449  ;;  %1455 = vtanh.f32 %v1050_v22  ;;  %v1335_v25 = vpop.f32.mrb[40].mxu0 }
 0x2b3   : > { %v1122_v26 = vmul.f32 %v1450_v23, %v1830_v18  ;;  %v1336_v27 = vpop.f32.mrb[41].mxu0 }
 0x2b4   : > { %v1452_v28 = vpop.eup %1451  ;;  %v1337_v17 = vadd.f32 %v1336_v27, %v1335_v25  ;;  %v1338_v29 = vpop.f32.mrb[42].mxu0 }
 0x2b5   : > { %v1143_v30 = vadd.f32 %v1836_v24, %v1122_v26  ;;  %v1123_v16 = vmul.f32 %v1452_v28, %v1830_v18  ;;  %v1339_v19 = vpop.f32.mrb[43].mxu0 }
 0x2b6   : > { %v1055_v31 = vadd.f32 %v1337_v17, %v1822_v3  ;;  %v1340_v32 = vadd.f32 %v1339_v19, %v1338_v29 }
 0x2b7   : > { %1160 = vst.msk [vmem:[%s1844_s13] sm:$0xff] %vm1159_vm2, %v1143_v30  ;;  %v1144_v33 = vadd.f32 %v1836_v24, %v1123_v16 }
 0x2b8   : > { %1457 = vtanh.f32 %v1055_v31  ;;  %v1058_v34 = vadd.f32 %v1340_v32, %v1822_v3 }
 0x2b9   : > { %1161 = vst.msk [vmem:[%s1844_s13 + $0x8] sm:$0xff] %vm1159_vm2, %v1144_v33 }
 0x2ba   : > { %v1454_v35 = vpop.eup %1453  ;;  %1459 = vtanh.f32 %v1058_v34  ;;  %v1341_v36 = vpop.f32.mrb[44].mxu0 }
 0x2bb   : > { %v1124_v37 = vmul.f32 %v1454_v35, %v1830_v18  ;;  %v1342_v38 = vpop.f32.mrb[45].mxu0 }
 0x2bc   : > { %v1456_v39 = vpop.eup %1455  ;;  %v1343_v40 = vadd.f32 %v1342_v38, %v1341_v36  ;;  %v1344_v41 = vpop.f32.mrb[46].mxu0 }
 0x2bd   : > { %v1145_v42 = vadd.f32 %v1836_v24, %v1124_v37  ;;  %v1125_v43 = vmul.f32 %v1456_v39, %v1830_v18  ;;  %v1345_v44 = vpop.f32.mrb[47].mxu0 }
 0x2be   : > { %v1063_v45 = vadd.f32 %v1343_v40, %v1822_v3  ;;  %v1346_v46 = vadd.f32 %v1345_v44, %v1344_v41 }
 0x2bf   : > { %1162 = vst.msk [vmem:[%s1844_s13 + $0x10] sm:$0xff] %vm1159_vm2, %v1145_v42  ;;  %v1146_v47 = vadd.f32 %v1836_v24, %v1125_v43 }
 0x2c0   : > { %1461 = vtanh.f32 %v1063_v45  ;;  %v1066_v48 = vadd.f32 %v1346_v46, %v1822_v3 }
 0x2c1   : > { %1163 = vst.msk [vmem:[%s1844_s13 + $0x18] sm:$0xff] %vm1159_vm2, %v1146_v47 }
 0x2c2   : > { %v1458_v49 = vpop.eup %1457  ;;  %1463 = vtanh.f32 %v1066_v48  ;;  %v1347_v50 = vpop.f32.mrb[48].mxu0 }
 0x2c3   : > { %v1126_v51 = vmul.f32 %v1458_v49, %v1830_v18  ;;  %v1348_v52 = vpop.f32.mrb[49].mxu0 }
 0x2c4   : > { %v1460_v53 = vpop.eup %1459  ;;  %v1349_v54 = vadd.f32 %v1348_v52, %v1347_v50  ;;  %v1350_v55 = vpop.f32.mrb[50].mxu0 }
 0x2c5   : > { %v1147_v56 = vadd.f32 %v1836_v24, %v1126_v51  ;;  %v1127_v57 = vmul.f32 %v1460_v53, %v1830_v18  ;;  %v1351_v58 = vpop.f32.mrb[51].mxu0 }
 0x2c6   : > { %v1071_v59 = vadd.f32 %v1349_v54, %v1822_v3  ;;  %v1352_v60 = vadd.f32 %v1351_v58, %v1350_v55 }
 0x2c7   : > { %1164 = vst.msk [vmem:[%s1844_s13 + $0x20] sm:$0xff] %vm1159_vm2, %v1147_v56  ;;  %v1148_v61 = vadd.f32 %v1836_v24, %v1127_v57 }
 0x2c8   : > { %1465 = vtanh.f32 %v1071_v59  ;;  %v1074_v62 = vadd.f32 %v1352_v60, %v1822_v3 }
 0x2c9   : > { %1165 = vst.msk [vmem:[%s1844_s13 + $0x28] sm:$0xff] %vm1159_vm2, %v1148_v61 }
 0x2ca   : > { %v1462_v63 = vpop.eup %1461  ;;  %1467 = vtanh.f32 %v1074_v62  ;;  %v1353_v0 = vpop.f32.mrb[52].mxu0 }
 0x2cb   : > { %v1128_v1 = vmul.f32 %v1462_v63, %v1830_v18  ;;  %v1354_v2 = vpop.f32.mrb[53].mxu0 }
 0x2cc   : > { %v1464_v4 = vpop.eup %1463  ;;  %v1355_v12 = vadd.f32 %v1354_v2, %v1353_v0  ;;  %v1356_v5 = vpop.f32.mrb[54].mxu0 }
 0x2cd   : > { %v1149_v6 = vadd.f32 %v1836_v24, %v1128_v1  ;;  %v1129_v13 = vmul.f32 %v1464_v4, %v1830_v18  ;;  %v1357_v7 = vpop.f32.mrb[55].mxu0 }
 0x2ce   : > { %v1079_v8 = vadd.f32 %v1355_v12, %v1822_v3  ;;  %v1358_v9 = vadd.f32 %v1357_v7, %v1356_v5 }
 0x2cf   : > { %1166 = vst.msk [vmem:[%s1844_s13 + $0x30] sm:$0xff] %vm1159_vm2, %v1149_v6  ;;  %v1150_v10 = vadd.f32 %v1836_v24, %v1129_v13 }
 0x2d0   : > { %1469 = vtanh.f32 %v1079_v8  ;;  %v1082_v11 = vadd.f32 %v1358_v9, %v1822_v3 }
 0x2d1   : > { %1167 = vst.msk [vmem:[%s1844_s13 + $0x38] sm:$0xff] %vm1159_vm2, %v1150_v10 }
 0x2d2   : > { %v1466_v20 = vpop.eup %1465  ;;  %1471 = vtanh.f32 %v1082_v11  ;;  %v1359_v21 = vpop.f32.mrb[56].mxu0 }
 0x2d3   : > { %v1130_v14 = vmul.f32 %v1466_v20, %v1830_v18  ;;  %v1360_v15 = vpop.f32.mrb[57].mxu0 }
 0x2d4   : > { %v1468_v22 = vpop.eup %1467  ;;  %v1361_v23 = vadd.f32 %v1360_v15, %v1359_v21  ;;  %v1362_v25 = vpop.f32.mrb[58].mxu0 }
 0x2d5   : > { %v1151_v26 = vadd.f32 %v1836_v24, %v1130_v14  ;;  %v1131_v27 = vmul.f32 %v1468_v22, %v1830_v18  ;;  %v1363_v28 = vpop.f32.mrb[59].mxu0 }
 0x2d6   : > { %v1087_v17 = vadd.f32 %v1361_v23, %v1822_v3  ;;  %v1364_v29 = vadd.f32 %v1363_v28, %v1362_v25 }
 0x2d7   : > { %1168 = vst.msk [vmem:[%s1844_s13 + $0x40] sm:$0xff] %vm1159_vm2, %v1151_v26  ;;  %v1152_v30 = vadd.f32 %v1836_v24, %v1131_v27 }
 0x2d8   : > { %1473 = vtanh.f32 %v1087_v17  ;;  %v1090_v16 = vadd.f32 %v1364_v29, %v1822_v3 }
 0x2d9   : > { %1169 = vst.msk [vmem:[%s1844_s13 + $0x48] sm:$0xff] %vm1159_vm2, %v1152_v30 }
 0x2da   : > { %v1470_v19 = vpop.eup %1469  ;;  %1475 = vtanh.f32 %v1090_v16  ;;  %v1365_v31 = vpop.f32.mrb[60].mxu0 }
 0x2db   : > { %v1132_v32 = vmul.f32 %v1470_v19, %v1830_v18  ;;  %v1366_v33 = vpop.f32.mrb[61].mxu0 }
 0x2dc   : > { %v1472_v34 = vpop.eup %1471  ;;  %v1367_v35 = vadd.f32 %v1366_v33, %v1365_v31  ;;  %v1368_v36 = vpop.f32.mrb[62].mxu0 }
 0x2dd   : > { %v1153_v37 = vadd.f32 %v1836_v24, %v1132_v32  ;;  %v1133_v38 = vmul.f32 %v1472_v34, %v1830_v18  ;;  %v1369_v39 = vpop.f32.mrb[63].mxu0 }
 0x2de   : > { %v1095_v40 = vadd.f32 %v1367_v35, %v1822_v3  ;;  %v1370_v41 = vadd.f32 %v1369_v39, %v1368_v36 }
 0x2df   : > { %1170 = vst.msk [vmem:[%s1844_s13 + $0x50] sm:$0xff] %vm1159_vm2, %v1153_v37  ;;  %v1154_v42 = vadd.f32 %v1836_v24, %v1133_v38 }
 0x2e0   : > { %1477 = vtanh.f32 %v1095_v40  ;;  %v1098_v43 = vadd.f32 %v1370_v41, %v1822_v3 }
 0x2e1   : > { %1171 = vst.msk [vmem:[%s1844_s13 + $0x58] sm:$0xff] %vm1159_vm2, %v1154_v42 }
 0x2e2   : > { %v1474_v44 = vpop.eup %1473  ;;  %1479 = vtanh.f32 %v1098_v43 }
 0x2e3   : > { %v1134_v45 = vmul.f32 %v1474_v44, %v1830_v18 }
 0x2e4   : > { %v1476_v46 = vpop.eup %1475 }
 0x2e5   : > { %v1155_v47 = vadd.f32 %v1836_v24, %v1134_v45  ;;  %v1135_v48 = vmul.f32 %v1476_v46, %v1830_v18 }
 0x2e7   : > { %1172 = vst.msk [vmem:[%s1844_s13 + $0x60] sm:$0xff] %vm1159_vm2, %v1155_v47  ;;  %v1156_v49 = vadd.f32 %v1836_v24, %v1135_v48 }
 0x2e9   : > { %1173 = vst.msk [vmem:[%s1844_s13 + $0x68] sm:$0xff] %vm1159_vm2, %v1156_v49 }
 0x2ea   : > { %v1478_v3 = vpop.eup %1477 }
 0x2eb   : > { %v1136_v50 = vmul.f32 %v1478_v3, %v1830_v18 }
 0x2ec   : > { %v1480_v51 = vpop.eup %1479 }
 0x2ed   : > { %v1157_v52 = vadd.f32 %v1836_v24, %v1136_v50  ;;  %v1137_v53 = vmul.f32 %v1480_v51, %v1830_v18 }
 0x2ef   : > { %1174 = vst.msk [vmem:[%s1844_s13 + $0x70] sm:$0xff] %vm1159_vm2, %v1157_v52  ;;  %v1158_v54 = vadd.f32 %v1836_v24, %v1137_v53 }
 0x2f1   : > { %1175 = vst.msk [vmem:[%s1844_s13 + $0x78] sm:$0xff] %vm1159_vm2, %v1158_v54 }
 0x2f2 PF: > { %s16_s21 = sadd.s32 1, %s1487_s21  }
 0x2f3   : > { %p13_p4 = scmp.ge.s32.totalorder %s16_s21, 4  }
 0x2f5   :  { %15 = sbr.rel (!%p13_p4) target bundleno = 1 (0x1), region = 75 }

</bundles_post_ra>
